<compile_context>
chip_gen: v5e
topology: v5e:2x2
jax: 0.10.0
libtpu: 0.0.40
codegen_flags: <defaults>
</compile_context>

<pallas_src>
import jax
import jax.numpy as jnp
from jax.experimental import pallas as pl
from jax.experimental.pallas import tpu as pltpu


def _frozen_bn_kernel(x_ref, scale_ref, bias_ref, o_ref):
    # One broadcast FMA per block.  scale/bias are (tile_r, 1) in the
    # per-row-param layout or (1, tile_l) in the per-lane-param layout;
    # jnp broadcasting handles both with the same body (VPU + store only).
    o_ref[...] = (x_ref[...] * scale_ref[...] + bias_ref[...]).astype(o_ref.dtype)


def _cdiv(a, b):
    return -(-a // b)


def _pick_tile(dim, unit, cap):
    """Tile size for one axis, never exceeding `cap` elements.

    Preference: (1) the full dim if it fits (always a legal block shape);
    (2) the largest multiple of `unit` that divides `dim` and is <= cap
    (exact grid); (3) the largest multiple of `unit` <= cap (ragged trailing
    block -- Pallas pads reads / masks writes, fine for elementwise).
    """
    cap = max(unit, int(cap))
    if dim <= cap:
        return dim
    hi = (cap // unit) * unit
    best = 0
    for t in range(hi, unit - 1, -unit):
        if dim % t == 0:
            best = t
            break
    if best >= hi // 2:       # exact tiling, unless it forces much smaller blocks
        return best
    return hi


def frozen_batch_norm_2d(x, weight, bias, running_mean, running_var, *, eps=1e-5):
    """x: (N, C, H, W); params: (C,). Returns (N, C, H, W), same dtype as x."""
    N, C, H, W = x.shape
    L = H * W
    itemsize = jnp.dtype(x.dtype).itemsize
    # Sub-32-bit dtypes pack along sublanes: keep row tiles in whole packed groups.
    row_unit = {4: 8, 2: 16, 1: 32}.get(itemsize, 8)

    # ---- fold frozen stats into per-channel scale/bias (O(C), once, f32) ----
    w32 = weight.astype(jnp.float32)
    b32 = bias.astype(jnp.float32)
    rm32 = running_mean.astype(jnp.float32)
    rv32 = running_var.astype(jnp.float32)
    scale_c = w32 * jax.lax.rsqrt(rv32 + jnp.float32(eps))   # (C,)
    bias_c = b32 - rm32 * scale_c                            # (C,)

    # ---- layout: keep the output lane dim wide / 128-aligned -----------------
    if L % 128 == 0:
        # (N*C, H*W): per-row params; lane dim already 128-aligned.
        rows, lanes = N * C, L
        x2d = x.reshape(rows, lanes)                         # contiguous, no transpose
        scale2d = jnp.tile(scale_c, N).reshape(rows, 1)      # row r -> channel r % C
        bias2d = jnp.tile(bias_c, N).reshape(rows, 1)
        params_per_row = True
    else:
        # Small / unaligned spatial (ResNet tails: H*W = 49, 196, ...):
        # (N, C*H*W) keeps stores lane-dense; params broadcast per lane.
        rows, lanes = N, C * L
        x2d = x.reshape(rows, lanes)                         # contiguous, no transpose
        scale2d = jnp.repeat(scale_c, L).reshape(1, lanes)
        bias2d = jnp.repeat(bias_c, L).reshape(1, lanes)
        params_per_row = False

    # ---- generation-aware VMEM budget (2x in + 2x out + 2x(scale,bias)) -----
    try:
        vmem_cap = int(pltpu.get_tpu_info().vmem_capacity_bytes)
    except Exception:
        vmem_cap = 64 << 20                                  # conservative (v7x)
    buf_budget = (24 << 20) if vmem_cap <= (64 << 20) else (32 << 20)

    if params_per_row:
        # (tile_r, 1) f32 params pad to 128 lanes -> 512 B/row/buffer (x4 buffers).
        cap_l = (buf_budget - 2048 * row_unit) // (4 * row_unit * itemsize)
        tile_l = _pick_tile(lanes, 128, cap_l)
        cap_r = buf_budget // (4 * tile_l * itemsize + 2048)
        tile_r = _pick_tile(rows, row_unit, cap_r)
    else:
        # (1, tile_l) f32 params pad to 8 sublanes -> 32 B/lane/buffer (x4 buffers).
        cap_l = buf_budget // (4 * row_unit * itemsize + 128)
        tile_l = _pick_tile(lanes, 128, cap_l)
        cap_r = max(row_unit, (buf_budget - 128 * tile_l) // (4 * tile_l * itemsize))
        tile_r = _pick_tile(rows, row_unit, cap_r)

    grid_r = _cdiv(rows, tile_r)
    grid_l = _cdiv(lanes, tile_l)

    # ---- best-effort megacore / pipelining split -----------------------------
    total_bytes = rows * lanes * itemsize
    big_enough = total_bytes >= (2 << 20)    # tiny tensors: 1-step grid is fine
    if big_enough:
        # Prefer splitting rows (per-row params then stay resident across the
        # inner lane loop); aim for an even leading extent >= 2 (v7x: 2 TCs).
        while ((grid_r < 2 or grid_r % 2 != 0)
               and tile_r % (2 * row_unit) == 0
               and tile_r * tile_l * itemsize > (512 << 10)):
            tile_r //= 2
            grid_r = _cdiv(rows, tile_r)
        # Keep enough total steps for DMA/compute overlap.
        while (grid_r * grid_l < 4
               and tile_l % 256 == 0
               and tile_r * tile_l * itemsize > (512 << 10)):
            tile_l //= 2
            grid_l = _cdiv(lanes, tile_l)
    # If the row axis could not be split, lead with the lane axis so the
    # parallel leading dimension still has >= 2 steps.
    lanes_leading = big_enough and grid_r == 1 and grid_l >= 2

    x_block = (tile_r, tile_l)
    p_block = (tile_r, 1) if params_per_row else (1, tile_l)

    if lanes_leading:
        grid = (grid_l, grid_r)
        x_map = lambda j, i: (i, j)
        p_map = (lambda j, i: (i, 0)) if params_per_row else (lambda j, i: (0, j))
    else:
        grid = (grid_r, grid_l)
        x_map = lambda i, j: (i, j)
        p_map = (lambda i, j: (i, 0)) if params_per_row else (lambda i, j: (0, j))

    x_spec = pl.BlockSpec(x_block, x_map)
    p_spec = pl.BlockSpec(p_block, p_map)

    # ---- explicit scoped-VMEM limit (v5e default is only 16 MiB) -------------
    blk_bytes = tile_r * tile_l * itemsize
    if params_per_row:
        p_bytes = 4 * (_cdiv(tile_r, 8) * 8) * 128 * 4
    else:
        p_bytes = 4 * 8 * (_cdiv(tile_l, 128) * 128) * 4
    vmem_needed = 4 * blk_bytes + p_bytes + (4 << 20)        # + compiler headroom
    vmem_limit = int(max(16 << 20, min(vmem_needed, vmem_cap - (16 << 20))))

    cost = pl.CostEstimate(
        flops=2 * rows * lanes,
        transcendentals=0,
        bytes_accessed=2 * rows * lanes * itemsize + 2 * 4 * int(scale2d.size))

    out2d = pl.pallas_call(
        _frozen_bn_kernel,
        out_shape=jax.ShapeDtypeStruct((rows, lanes), x.dtype),
        grid=grid,
        in_specs=[x_spec, p_spec, p_spec],
        out_specs=x_spec,
        compiler_params=pltpu.CompilerParams(
            dimension_semantics=("parallel", "parallel"),
            vmem_limit_bytes=vmem_limit),
        cost_estimate=cost,
    )(x2d, scale2d, bias2d)

    # Contiguous reshape back to NCHW (no transpose).
    return out2d.reshape(N, C, H, W)


def _reference(x, weight, bias, running_mean, running_var, eps=1e-5):
    w = weight.reshape(1, -1, 1, 1).astype(jnp.float32)
    b = bias.reshape(1, -1, 1, 1).astype(jnp.float32)
    rv = running_var.reshape(1, -1, 1, 1).astype(jnp.float32)
    rm = running_mean.reshape(1, -1, 1, 1).astype(jnp.float32)
    scale = w * jax.lax.rsqrt(rv + eps)
    return x.astype(jnp.float32) * scale + (b - rm * scale)


if __name__ == "__main__":
    key = jax.random.PRNGKey(0)
    kx, kw, kb, km, kv = jax.random.split(key, 5)

    N, C, H, W = 2, 4, 16, 16
    # Deterministic "frozen" buffers (perturbed so the affine map is non-trivial).
    weight = jnp.ones((C,), jnp.float32) + 0.1 * jax.random.normal(kw, (C,), jnp.float32)
    bias = 0.1 * jax.random.normal(kb, (C,), jnp.float32)
    running_mean = 0.1 * jax.random.normal(km, (C,), jnp.float32)
    running_var = jnp.ones((C,), jnp.float32) + 0.1 * jnp.abs(
        jax.random.normal(kv, (C,), jnp.float32))

    # 1) f32, 128-aligned spatial -> per-row-param layout.
    x = jax.random.normal(kx, (N, C, H, W), dtype=jnp.float32)
    out = jax.block_until_ready(
        frozen_batch_norm_2d(x, weight, bias, running_mean, running_var))
    ref = _reference(x, weight, bias, running_mean, running_var)
    assert out.shape == (N, C, H, W)
    assert jnp.allclose(out, ref, atol=1e-5, rtol=1e-5), "f32 aligned mismatch"

    # 2) f32, small unaligned spatial (ResNet-tail regime) -> per-lane-param layout.
    x7 = jax.random.normal(kx, (N, C, 7, 7), dtype=jnp.float32)
    out7 = jax.block_until_ready(
        frozen_batch_norm_2d(x7, weight, bias, running_mean, running_var))
    ref7 = _reference(x7, weight, bias, running_mean, running_var)
    assert jnp.allclose(out7, ref7, atol=1e-5, rtol=1e-5), "f32 unaligned mismatch"

    # 3) bf16 activations (dtype-aware sublane granularity, f32 compute, bf16 store).
    xb = jax.random.normal(kx, (N, C, H, W), dtype=jnp.float32).astype(jnp.bfloat16)
    outb = jax.block_until_ready(
        frozen_batch_norm_2d(xb, weight, bias, running_mean, running_var))
    refb = _reference(xb.astype(jnp.float32), weight, bias, running_mean, running_var)
    assert jnp.allclose(outb.astype(jnp.float32), refb, atol=2e-2, rtol=2e-2), "bf16 mismatch"

    print("KERNEL_OK")
</pallas_src>

<mosaic_0001>
module attributes {stable_mosaic.version = 11 : i64} {
  func.func @_frozen_bn_kernel(%arg0: i32, %arg1: i32, %arg2: memref<8x256xf32, #tpu.memory_space<vmem>>, %arg3: memref<8x1xf32, #tpu.memory_space<vmem>>, %arg4: memref<8x1xf32, #tpu.memory_space<vmem>>, %arg5: memref<8x256xf32, #tpu.memory_space<vmem>>) attributes {dimension_semantics = [#tpu.dimension_semantics<parallel>, #tpu.dimension_semantics<parallel>], iteration_bounds = array<i64: 1, 1>, scalar_prefetch = 0 : i64, scratch_operands = 0 : i64, tpu.core_type = #tpu.core_type<tc>, window_params = [{transform_indices = @transform_0, window_bounds = array<i64: 8, 256>}, {transform_indices = @transform_1, window_bounds = array<i64: 8, 1>}, {transform_indices = @transform_2, window_bounds = array<i64: 8, 1>}, {transform_indices = @transform_3, window_bounds = array<i64: 8, 256>}]} {
    %c0 = arith.constant 0 : index
    %c0_0 = arith.constant 0 : index
    %0 = vector.load %arg2[%c0, %c0_0] : memref<8x256xf32, #tpu.memory_space<vmem>>, vector<8x256xf32>
    %c0_1 = arith.constant 0 : index
    %c0_2 = arith.constant 0 : index
    %1 = vector.load %arg3[%c0_1, %c0_2] : memref<8x1xf32, #tpu.memory_space<vmem>>, vector<8x1xf32>
    %2 = vector.broadcast %1 : vector<8x1xf32> to vector<8x256xf32>
    %3 = arith.mulf %0, %2 : vector<8x256xf32>
    %c0_3 = arith.constant 0 : index
    %c0_4 = arith.constant 0 : index
    %4 = vector.load %arg4[%c0_3, %c0_4] : memref<8x1xf32, #tpu.memory_space<vmem>>, vector<8x1xf32>
    %5 = vector.broadcast %4 : vector<8x1xf32> to vector<8x256xf32>
    %6 = arith.addf %3, %5 : vector<8x256xf32>
    %c0_5 = arith.constant 0 : index
    %c0_6 = arith.constant 0 : index
    %7 = vector.load %arg5[%c0_5, %c0_6] : memref<8x256xf32, #tpu.memory_space<vmem>>, vector<8x256xf32>
    tpu.vector_store %arg5[%c0_5, %c0_6], %6 {strides = array<i32>} : memref<8x256xf32, #tpu.memory_space<vmem>>, vector<8x256xf32>,
    return
  }
  func.func @transform_0(%arg0: i32, %arg1: i32) -> (i32, i32) {
    %c0_i32 = arith.constant 0 : i32
    return %arg0, %arg1 : i32, i32
  }
  func.func @transform_1(%arg0: i32, %arg1: i32) -> (i32, i32) {
    %c0_i32 = arith.constant 0 : i32
    %c0_i32_0 = arith.constant 0 : i32
    return %arg0, %c0_i32 : i32, i32
  }
  func.func @transform_2(%arg0: i32, %arg1: i32) -> (i32, i32) {
    %c0_i32 = arith.constant 0 : i32
    %c0_i32_0 = arith.constant 0 : i32
    return %arg0, %c0_i32 : i32, i32
  }
  func.func @transform_3(%arg0: i32, %arg1: i32) -> (i32, i32) {
    %c0_i32 = arith.constant 0 : i32
    return %arg0, %arg1 : i32, i32
  }
}

</mosaic_0001>

<bundles_post_ra>
// kernel: tpu_custom_call.1
= control target key start
LH: loop header
LB: loop body
LE: loop exit
PB: predicated region body
PF: predicated region fallthrough
CT: control target
= control target key end

     0   :  { %s117_s0 = inlined_call_operand.vmem [shape: f32[8,256], index: 0, kind: input, shape index: {}]   ;;  %s118_s1 = inlined_call_operand.vmem [shape: f32[8,1], index: 1, kind: input, shape index: {}]   ;;  %s119_s2 = inlined_call_operand.vmem [shape: f32[8,1], index: 2, kind: input, shape index: {}]   ;;  %s120_s3 = inlined_call_operand.hbm [shape: f32[8,256], index: 3, kind: output, shape index: {}]  }
   0x1   :  { %v17_v0 = vld [vmem:[%s118_s1] sm:$0xff] }
   0x2   :  { %8 = vsyncpa [#allocation3], 0  ;;  %v80_v1 = vmov 0   ;;  %v25_v2 = vld [vmem:[%s119_s2] sm:$0xff]  ;;  %v16_v5 = vld [vmem:[%s117_s0 + $0x8] sm:$0xff]  ;;  %s81_s1 = smov [#allocation2]  }
   0x3   :  { %53 = vset.pattern.permute.xlu0 %v80_v1  ;;  %v15_v4 = vld [vmem:[%s117_s0] sm:$0xff]  ;;  %s40_s20 = sshll.u32 %s81_s1, 4  ;;  %s42_s23 = sshll.u32 %s120_s3, 4  ;;  %s41_s20 = int_to_ptr.vmem [resolvable:$true] %s40_s20  ;;  %s43_s23 = int_to_ptr.hbm [resolvable:$true] %s42_s23 }
   0x4   :  { %20 = vperm.xlu0 %53, %v17_v0  }
   0xc   :  { %28 = vperm.xlu0 %53, %v25_v2  }
  0x76   :  { %v21_v3 = vpop.permute.xlu0 %20 }
  0x77   :  { %v23_v6 = vmul.f32 %v21_v3, %v15_v4  ;;  %v24_v7 = vmul.f32 %v21_v3, %v16_v5 }
  0x7e   :  { %v29_v8 = vpop.permute.xlu0 %28 }
  0x7f   :  { %v31_v9 = vadd.f32 %v29_v8, %v23_v6  ;;  %v32_v10 = vadd.f32 %v29_v8, %v24_v7 }
  0x81   :  { %33 = vst [vmem:[#allocation2] sm:$0xff] %v31_v9 }
  0x82   :  { %34 = vst [vmem:[#allocation2 + $0x8] sm:$0xff] %v32_v10 }
  0x83   :  { %45 = dma.vmem_to_hbm [thread:$0]  %s41_s20, 256, %s43_s23, [#allocation3]  }
  0x84   :  { %78 = dma.done.wait [#allocation3], 256  }
  0x85   :  { %79 = vsyncadd [#allocation3], 4294967040 }
  0x86   :  { %50 = vsyncpa [#allocation3], 1 }

</bundles_post_ra>
